<compile_context>
chip_gen: v7x
topology: tpu7x:2x2x1
jax: 0.10.0
libtpu: 0.0.40
codegen_flags: <defaults>
</compile_context>

<pallas_src>
import functools

import jax
import jax.numpy as jnp
from jax.experimental import pallas as pl
from jax.experimental.pallas import tpu as pltpu

EPS = 1e-5
_VMEM_LIMIT = 32 * 1024 * 1024      # explicit scoped-VMEM budget (safe on v5e/v6e/v7x)
_MAX_TILE_LANES = 2048              # target flat-spatial tile width (lanes)


def _choose_row_tile(H, W, pool):
    """Image rows per pass-1 block: flat tiles 128-aligned, or the full extent."""
    step = 2 if pool else 1
    if H * W <= 2 * _MAX_TILE_LANES:
        return H                                  # whole rows -> exempt from (8,128)
    best = None
    for cand in range(step, H + 1, step):
        if H % cand:
            continue
        ts = cand * W
        if ts > _MAX_TILE_LANES:
            break
        tp = ts // 4 if pool else ts
        if ts % 128 == 0 and tp % 128 == 0:
            best = cand
    return best if best is not None else H


def _choose_col_tile(S):
    """Pooled-spatial tile for pass 2: multiple of 128 or the full extent."""
    if S <= 2 * _MAX_TILE_LANES:
        return S
    best = None
    for cand in range(128, min(S, _MAX_TILE_LANES) + 1, 128):
        if S % cand == 0:
            best = cand
    return best if best is not None else S


def _make_pool_matrix(TH, W):
    """(TH*W, (TH//2)*(W//2)) matrix expressing 2x2/stride-2 average pooling."""
    THp, Wp = TH // 2, W // 2
    s = jnp.arange(TH * W)
    h, w = s // W, s % W
    m = (h // 2) * Wp + (w // 2)
    return (m[:, None] == jnp.arange(THp * Wp)[None, :]).astype(jnp.float32) * 0.25


# ----------------------------- kernels --------------------------------------

def _pool_stats_kernel(x_ref, p_ref, w_ref, xp_ref, ssum_ref, ssq_ref):
    """x:(Cin,TS)  P:(TS,TMp)  w:(Cout,Cin) -> xp:(Cin,TMp) + per-image y stats."""
    t = pl.program_id(1)
    x2 = x_ref[...].astype(jnp.float32)
    xp = jnp.dot(x2, p_ref[...], preferred_element_type=jnp.float32)   # 2x2 avg pool
    xp_ref[...] = xp.astype(xp_ref.dtype)
    y = jnp.dot(w_ref[...], xp, preferred_element_type=jnp.float32)    # 1x1 conv (stats)

    @pl.when(t == 0)
    def _init():
        ssum_ref[...] = jnp.zeros_like(ssum_ref)
        ssq_ref[...] = jnp.zeros_like(ssq_ref)

    ssum_ref[...] += jnp.sum(y, axis=1, keepdims=True)
    ssq_ref[...] += jnp.sum(y * y, axis=1, keepdims=True)


def _stats_kernel(x_ref, w_ref, ssum_ref, ssq_ref):
    """stride==1 variant: no pooling, statistics only."""
    t = pl.program_id(1)
    y = jnp.dot(w_ref[...], x_ref[...].astype(jnp.float32),
                preferred_element_type=jnp.float32)

    @pl.when(t == 0)
    def _init():
        ssum_ref[...] = jnp.zeros_like(ssum_ref)
        ssq_ref[...] = jnp.zeros_like(ssq_ref)

    ssum_ref[...] += jnp.sum(y, axis=1, keepdims=True)
    ssq_ref[...] += jnp.sum(y * y, axis=1, keepdims=True)


def _apply_kernel(xp_ref, w_ref, b_ref, o_ref):
    """Folded conv + BN: o = W_fold @ xp + b_fold; lane-dense (Cout, TM) store."""
    y = jnp.dot(w_ref[...], xp_ref[...].astype(jnp.float32),
                preferred_element_type=jnp.float32) + b_ref[...]
    o_ref[...] = y.astype(o_ref.dtype)


# ----------------------------- wrapper ---------------------------------------

@functools.partial(jax.jit, static_argnames=("stride",))
def downsample(x_nchw, w, gamma, beta, *, stride):
    """x_nchw: (N, Cin, H, W);  w: (Cout, Cin) (1x1 conv weight, 1x1 squeezed);
       gamma, beta: (Cout,) BatchNorm affine.  Returns NCHW (N, Cout, Hp, Wp)."""
    N, Cin, H, W = x_nchw.shape
    Cout = w.shape[0]
    pool = (stride == 2)
    if pool:
        assert H % 2 == 0 and W % 2 == 0, "AvgPool2d(2,2) path expects even H, W"
    Hp, Wp = (H // 2, W // 2) if pool else (H, W)
    Sp = Hp * Wp
    out_dtype = x_nchw.dtype

    wf32 = w.astype(jnp.float32)
    x_flat = x_nchw.reshape(N, Cin, H * W)          # free reshape (trailing dims)

    TH = _choose_row_tile(H, W, pool)
    TS = TH * W
    n_t = H // TH

    cparams1 = pltpu.CompilerParams(
        dimension_semantics=("parallel", "arbitrary"),
        vmem_limit_bytes=_VMEM_LIMIT)

    stat_shape = jax.ShapeDtypeStruct((N, Cout, 1), jnp.float32)
    stat_spec = pl.BlockSpec((None, Cout, 1), lambda n, t: (n, 0, 0))

    if pool:
        TMp = TS // 4
        pmat = _make_pool_matrix(TH, W)
        xp_flat, ssum, ssq = pl.pallas_call(
            _pool_stats_kernel,
            out_shape=(jax.ShapeDtypeStruct((N, Cin, Sp), jnp.float32),
                       stat_shape, stat_shape),
            grid=(N, n_t),
            in_specs=[pl.BlockSpec((None, Cin, TS), lambda n, t: (n, 0, t)),
                      pl.BlockSpec((TS, TMp), lambda n, t: (0, 0)),
                      pl.BlockSpec((Cout, Cin), lambda n, t: (0, 0))],
            out_specs=(pl.BlockSpec((None, Cin, TMp), lambda n, t: (n, 0, t)),
                       stat_spec, stat_spec),
            compiler_params=cparams1,
        )(x_flat, pmat, wf32)
    else:
        ssum, ssq = pl.pallas_call(
            _stats_kernel,
            out_shape=(stat_shape, stat_shape),
            grid=(N, n_t),
            in_specs=[pl.BlockSpec((None, Cin, TS), lambda n, t: (n, 0, t)),
                      pl.BlockSpec((Cout, Cin), lambda n, t: (0, 0))],
            out_specs=(stat_spec, stat_spec),
            compiler_params=cparams1,
        )(x_flat, wf32)
        xp_flat = x_flat                              # identity path (no pooling)

    # --- fold BatchNorm (training-mode, biased variance) into the 1x1 conv ---
    m_total = N * Sp
    sum_y = jnp.sum(ssum, axis=0)[:, 0]
    sum_y2 = jnp.sum(ssq, axis=0)[:, 0]
    mean = sum_y / m_total
    var = jnp.maximum(sum_y2 / m_total - mean * mean, 0.0)
    scale = gamma.astype(jnp.float32) * jax.lax.rsqrt(var + EPS)
    w_fold = wf32 * scale[:, None]                    # (Cout, Cin)
    b_fold = (beta.astype(jnp.float32) - mean * scale).reshape(Cout, 1)

    TM = _choose_col_tile(Sp)
    out_flat = pl.pallas_call(
        _apply_kernel,
        out_shape=jax.ShapeDtypeStruct((N, Cout, Sp), out_dtype),
        grid=(N, Sp // TM),
        in_specs=[pl.BlockSpec((None, Cin, TM), lambda n, m: (n, 0, m)),
                  pl.BlockSpec((Cout, Cin), lambda n, m: (0, 0)),
                  pl.BlockSpec((Cout, 1), lambda n, m: (0, 0))],
        out_specs=pl.BlockSpec((None, Cout, TM), lambda n, m: (n, 0, m)),
        compiler_params=pltpu.CompilerParams(
            dimension_semantics=("parallel", "parallel"),
            vmem_limit_bytes=_VMEM_LIMIT),
    )(xp_flat, w_fold, b_fold)

    return out_flat.reshape(N, Cout, Hp, Wp)


# ----------------------------- reference --------------------------------------

def downsample_reference(x_nchw, w, gamma, beta, *, stride):
    """Pure-JAX reference mirroring the PyTorch module (training-mode BN)."""
    x = x_nchw.astype(jnp.float32)
    if stride == 2:
        x = (x[:, :, 0::2, 0::2] + x[:, :, 0::2, 1::2]
             + x[:, :, 1::2, 0::2] + x[:, :, 1::2, 1::2]) * 0.25
    y = jnp.einsum('nchw,oc->nohw', x, w.astype(jnp.float32),
                   precision=jax.lax.Precision.HIGHEST)
    mean = jnp.mean(y, axis=(0, 2, 3), keepdims=True)
    var = jnp.mean((y - mean) ** 2, axis=(0, 2, 3), keepdims=True)
    yn = (y - mean) * jax.lax.rsqrt(var + EPS)
    return yn * gamma.reshape(1, -1, 1, 1) + beta.reshape(1, -1, 1, 1)


if __name__ == "__main__":
    key = jax.random.PRNGKey(0)
    k_x, k_w, k_g, k_b = jax.random.split(key, 4)

    N, Cin, H, W = 2, 4, 16, 16
    Cout = 8

    x = jax.random.normal(k_x, (N, Cin, H, W), dtype=jnp.float32)
    # 1x1 conv weight (Cout, Cin, 1, 1) stored with the trailing 1x1 squeezed
    w = jax.random.normal(k_w, (Cout, Cin), dtype=jnp.float32) * 0.1
    gamma = 1.0 + 0.1 * jax.random.normal(k_g, (Cout,), dtype=jnp.float32)
    beta = 0.1 * jax.random.normal(k_b, (Cout,), dtype=jnp.float32)

    # stride == 2 : AvgPool(2,2) -> 1x1 conv -> BN
    out = jax.block_until_ready(downsample(x, w, gamma, beta, stride=2))
    ref = downsample_reference(x, w, gamma, beta, stride=2)
    assert out.shape == (N, Cout, H // 2, W // 2), out.shape
    assert jnp.allclose(out, ref, atol=1e-4, rtol=1e-4), \
        float(jnp.max(jnp.abs(out - ref)))

    # stride == 1 : Identity -> 1x1 conv -> BN
    out1 = jax.block_until_ready(downsample(x, w, gamma, beta, stride=1))
    ref1 = downsample_reference(x, w, gamma, beta, stride=1)
    assert out1.shape == (N, Cout, H, W), out1.shape
    assert jnp.allclose(out1, ref1, atol=1e-4, rtol=1e-4), \
        float(jnp.max(jnp.abs(out1 - ref1)))

    print("KERNEL_OK")
</pallas_src>

<mosaic_0001>
module attributes {stable_mosaic.version = 11 : i64} {
  func.func @_pool_stats_kernel(%arg0: i32, %arg1: i32, %arg2: memref<1x4x256xf32, #tpu.memory_space<vmem>>, %arg3: memref<256x64xf32, #tpu.memory_space<vmem>>, %arg4: memref<8x4xf32, #tpu.memory_space<vmem>>, %arg5: memref<1x4x64xf32, #tpu.memory_space<vmem>>, %arg6: memref<1x8x1xf32, #tpu.memory_space<vmem>>, %arg7: memref<1x8x1xf32, #tpu.memory_space<vmem>>) attributes {dimension_semantics = [#tpu.dimension_semantics<parallel>, #tpu.dimension_semantics<arbitrary>], iteration_bounds = array<i64: 2, 1>, scalar_prefetch = 0 : i64, scratch_operands = 0 : i64, tpu.core_type = #tpu.core_type<tc>, window_params = [{transform_indices = @transform_0, window_bounds = array<i64: 1, 4, 256>}, {pipeline_mode = #tpu.pipeline_mode<synchronous>, transform_indices = @transform_1, window_bounds = array<i64: 256, 64>}, {pipeline_mode = #tpu.pipeline_mode<synchronous>, transform_indices = @transform_2, window_bounds = array<i64: 8, 4>}, {transform_indices = @transform_3, window_bounds = array<i64: 1, 4, 64>}, {transform_indices = @transform_4, window_bounds = array<i64: 1, 8, 1>}, {transform_indices = @transform_5, window_bounds = array<i64: 1, 8, 1>}]} {
    %c0 = arith.constant 0 : index
    %c0_0 = arith.constant 0 : index
    %c0_1 = arith.constant 0 : index
    %0 = vector.load %arg2[%c0, %c0_0, %c0_1] : memref<1x4x256xf32, #tpu.memory_space<vmem>>, vector<1x4x256xf32>
    %1 = vector.shape_cast %0 : vector<1x4x256xf32> to vector<4x256xf32>
    %c0_2 = arith.constant 0 : index
    %c0_3 = arith.constant 0 : index
    %2 = vector.load %arg3[%c0_2, %c0_3] : memref<256x64xf32, #tpu.memory_space<vmem>>, vector<256x64xf32>
    %cst = arith.constant dense<0.000000e+00> : vector<4x64xf32>
    %3 = tpu.matmul %1, %2, %cst {dimension_numbers = #tpu.dot_dimension_numbers<[1], [0], [0], [1], [0, 0, 1, 1], [], []>} : vector<4x256xf32>, vector<256x64xf32>, vector<4x64xf32> -> vector<4x64xf32>
    %c0_4 = arith.constant 0 : index
    %c0_5 = arith.constant 0 : index
    %c0_6 = arith.constant 0 : index
    %4 = vector.load %arg5[%c0_4, %c0_5, %c0_6] : memref<1x4x64xf32, #tpu.memory_space<vmem>>, vector<1x4x64xf32>
    %5 = vector.shape_cast %4 : vector<1x4x64xf32> to vector<4x64xf32>
    %6 = vector.shape_cast %3 : vector<4x64xf32> to vector<1x4x64xf32>
    tpu.vector_store %arg5[%c0_4, %c0_5, %c0_6], %6 {strides = array<i32>} : memref<1x4x64xf32, #tpu.memory_space<vmem>>, vector<1x4x64xf32>,
    %c0_7 = arith.constant 0 : index
    %c0_8 = arith.constant 0 : index
    %7 = vector.load %arg4[%c0_7, %c0_8] : memref<8x4xf32, #tpu.memory_space<vmem>>, vector<8x4xf32>
    %cst_9 = arith.constant dense<0.000000e+00> : vector<8x64xf32>
    %8 = tpu.matmul %7, %3, %cst_9 {dimension_numbers = #tpu.dot_dimension_numbers<[1], [0], [0], [1], [0, 0, 1, 1], [], []>} : vector<8x4xf32>, vector<4x64xf32>, vector<8x64xf32> -> vector<8x64xf32>
    %c0_i32 = arith.constant 0 : i32
    %9 = arith.cmpi eq, %arg1, %c0_i32 : i32
    %10 = arith.extui %9 : i1 to i32
    %c0_i32_10 = arith.constant 0 : i32
    %11 = arith.cmpi ne, %10, %c0_i32_10 : i32
    scf.if %11 {
      %cst_25 = arith.constant 0.000000e+00 : f32
      %29 = vector.broadcast %cst_25 : f32 to vector<8x1xf32>
      %c0_26 = arith.constant 0 : index
      %c0_27 = arith.constant 0 : index
      %c0_28 = arith.constant 0 : index
      %30 = vector.load %arg6[%c0_26, %c0_27, %c0_28] : memref<1x8x1xf32, #tpu.memory_space<vmem>>, vector<1x8x1xf32>
      %31 = vector.shape_cast %30 : vector<1x8x1xf32> to vector<8x1xf32>
      %32 = vector.shape_cast %29 : vector<8x1xf32> to vector<1x8x1xf32>
      tpu.vector_store %arg6[%c0_26, %c0_27, %c0_28], %32 {strides = array<i32>} : memref<1x8x1xf32, #tpu.memory_space<vmem>>, vector<1x8x1xf32>,
      %cst_29 = arith.constant 0.000000e+00 : f32
      %33 = vector.broadcast %cst_29 : f32 to vector<8x1xf32>
      %c0_30 = arith.constant 0 : index
      %c0_31 = arith.constant 0 : index
      %c0_32 = arith.constant 0 : index
      %34 = vector.load %arg7[%c0_30, %c0_31, %c0_32] : memref<1x8x1xf32, #tpu.memory_space<vmem>>, vector<1x8x1xf32>
      %35 = vector.shape_cast %34 : vector<1x8x1xf32> to vector<8x1xf32>
      %36 = vector.shape_cast %33 : vector<8x1xf32> to vector<1x8x1xf32>
      tpu.vector_store %arg7[%c0_30, %c0_31, %c0_32], %36 {strides = array<i32>} : memref<1x8x1xf32, #tpu.memory_space<vmem>>, vector<1x8x1xf32>,
    } else {
    }
    %c0_11 = arith.constant 0 : index
    %c0_12 = arith.constant 0 : index
    %c0_13 = arith.constant 0 : index
    %12 = vector.load %arg6[%c0_11, %c0_12, %c0_13] : memref<1x8x1xf32, #tpu.memory_space<vmem>>, vector<1x8x1xf32>
    %13 = vector.shape_cast %12 : vector<1x8x1xf32> to vector<8x1xf32>
    %cst_14 = arith.constant dense<0.000000e+00> : vector<8xf32>
    %14 = vector.multi_reduction <add>, %8, %cst_14 [1] : vector<8x64xf32> to vector<8xf32>
    %15 = vector.shape_cast %14 : vector<8xf32> to vector<8x1xf32>
    %16 = arith.addf %13, %15 : vector<8x1xf32>
    %c0_15 = arith.constant 0 : index
    %c0_16 = arith.constant 0 : index
    %c0_17 = arith.constant 0 : index
    %17 = vector.load %arg6[%c0_15, %c0_16, %c0_17] : memref<1x8x1xf32, #tpu.memory_space<vmem>>, vector<1x8x1xf32>
    %18 = vector.shape_cast %17 : vector<1x8x1xf32> to vector<8x1xf32>
    %19 = vector.shape_cast %16 : vector<8x1xf32> to vector<1x8x1xf32>
    tpu.vector_store %arg6[%c0_15, %c0_16, %c0_17], %19 {strides = array<i32>} : memref<1x8x1xf32, #tpu.memory_space<vmem>>, vector<1x8x1xf32>,
    %c0_18 = arith.constant 0 : index
    %c0_19 = arith.constant 0 : index
    %c0_20 = arith.constant 0 : index
    %20 = vector.load %arg7[%c0_18, %c0_19, %c0_20] : memref<1x8x1xf32, #tpu.memory_space<vmem>>, vector<1x8x1xf32>
    %21 = vector.shape_cast %20 : vector<1x8x1xf32> to vector<8x1xf32>
    %22 = arith.mulf %8, %8 : vector<8x64xf32>
    %cst_21 = arith.constant dense<0.000000e+00> : vector<8xf32>
    %23 = vector.multi_reduction <add>, %22, %cst_21 [1] : vector<8x64xf32> to vector<8xf32>
    %24 = vector.shape_cast %23 : vector<8xf32> to vector<8x1xf32>
    %25 = arith.addf %21, %24 : vector<8x1xf32>
    %c0_22 = arith.constant 0 : index
    %c0_23 = arith.constant 0 : index
    %c0_24 = arith.constant 0 : index
    %26 = vector.load %arg7[%c0_22, %c0_23, %c0_24] : memref<1x8x1xf32, #tpu.memory_space<vmem>>, vector<1x8x1xf32>
    %27 = vector.shape_cast %26 : vector<1x8x1xf32> to vector<8x1xf32>
    %28 = vector.shape_cast %25 : vector<8x1xf32> to vector<1x8x1xf32>
    tpu.vector_store %arg7[%c0_22, %c0_23, %c0_24], %28 {strides = array<i32>} : memref<1x8x1xf32, #tpu.memory_space<vmem>>, vector<1x8x1xf32>,
    return
  }
  func.func @transform_0(%arg0: i32, %arg1: i32) -> (i32, i32, i32) {
    %c0_i32 = arith.constant 0 : i32
    %c0_i32_0 = arith.constant 0 : i32
    return %arg0, %c0_i32, %arg1 : i32, i32, i32
  }
  func.func @transform_1(%arg0: i32, %arg1: i32) -> (i32, i32) {
    %c0_i32 = arith.constant 0 : i32
    %c0_i32_0 = arith.constant 0 : i32
    %c0_i32_1 = arith.constant 0 : i32
    return %c0_i32, %c0_i32_0 : i32, i32
  }
  func.func @transform_2(%arg0: i32, %arg1: i32) -> (i32, i32) {
    %c0_i32 = arith.constant 0 : i32
    %c0_i32_0 = arith.constant 0 : i32
    %c0_i32_1 = arith.constant 0 : i32
    return %c0_i32, %c0_i32_0 : i32, i32
  }
  func.func @transform_3(%arg0: i32, %arg1: i32) -> (i32, i32, i32) {
    %c0_i32 = arith.constant 0 : i32
    %c0_i32_0 = arith.constant 0 : i32
    return %arg0, %c0_i32, %arg1 : i32, i32, i32
  }
  func.func @transform_4(%arg0: i32, %arg1: i32) -> (i32, i32, i32) {
    %c0_i32 = arith.constant 0 : i32
    %c0_i32_0 = arith.constant 0 : i32
    %c0_i32_1 = arith.constant 0 : i32
    return %arg0, %c0_i32, %c0_i32_0 : i32, i32, i32
  }
  func.func @transform_5(%arg0: i32, %arg1: i32) -> (i32, i32, i32) {
    %c0_i32 = arith.constant 0 : i32
    %c0_i32_0 = arith.constant 0 : i32
    %c0_i32_1 = arith.constant 0 : i32
    return %arg0, %c0_i32, %c0_i32_0 : i32, i32, i32
  }
}

module attributes {stable_mosaic.version = 11 : i64} {
  func.func @_apply_kernel(%arg0: i32, %arg1: i32, %arg2: memref<1x4x64xf32, #tpu.memory_space<vmem>>, %arg3: memref<8x4xf32, #tpu.memory_space<vmem>>, %arg4: memref<8x1xf32, #tpu.memory_space<vmem>>, %arg5: memref<1x8x64xf32, #tpu.memory_space<vmem>>) attributes {dimension_semantics = [#tpu.dimension_semantics<parallel>, #tpu.dimension_semantics<parallel>], iteration_bounds = array<i64: 2, 1>, scalar_prefetch = 0 : i64, scratch_operands = 0 : i64, tpu.core_type = #tpu.core_type<tc>, window_params = [{transform_indices = @transform_0, window_bounds = array<i64: 1, 4, 64>}, {pipeline_mode = #tpu.pipeline_mode<synchronous>, transform_indices = @transform_1, window_bounds = array<i64: 8, 4>}, {pipeline_mode = #tpu.pipeline_mode<synchronous>, transform_indices = @transform_2, window_bounds = array<i64: 8, 1>}, {transform_indices = @transform_3, window_bounds = array<i64: 1, 8, 64>}]} {
    %c0 = arith.constant 0 : index
    %c0_0 = arith.constant 0 : index
    %0 = vector.load %arg3[%c0, %c0_0] : memref<8x4xf32, #tpu.memory_space<vmem>>, vector<8x4xf32>
    %c0_1 = arith.constant 0 : index
    %c0_2 = arith.constant 0 : index
    %c0_3 = arith.constant 0 : index
    %1 = vector.load %arg2[%c0_1, %c0_2, %c0_3] : memref<1x4x64xf32, #tpu.memory_space<vmem>>, vector<1x4x64xf32>
    %2 = vector.shape_cast %1 : vector<1x4x64xf32> to vector<4x64xf32>
    %cst = arith.constant dense<0.000000e+00> : vector<8x64xf32>
    %3 = tpu.matmul %0, %2, %cst {dimension_numbers = #tpu.dot_dimension_numbers<[1], [0], [0], [1], [0, 0, 1, 1], [], []>} : vector<8x4xf32>, vector<4x64xf32>, vector<8x64xf32> -> vector<8x64xf32>
    %c0_4 = arith.constant 0 : index
    %c0_5 = arith.constant 0 : index
    %4 = vector.load %arg4[%c0_4, %c0_5] : memref<8x1xf32, #tpu.memory_space<vmem>>, vector<8x1xf32>
    %5 = vector.broadcast %4 : vector<8x1xf32> to vector<8x64xf32>
    %6 = arith.addf %3, %5 : vector<8x64xf32>
    %c0_6 = arith.constant 0 : index
    %c0_7 = arith.constant 0 : index
    %c0_8 = arith.constant 0 : index
    %7 = vector.load %arg5[%c0_6, %c0_7, %c0_8] : memref<1x8x64xf32, #tpu.memory_space<vmem>>, vector<1x8x64xf32>
    %8 = vector.shape_cast %7 : vector<1x8x64xf32> to vector<8x64xf32>
    %9 = vector.shape_cast %6 : vector<8x64xf32> to vector<1x8x64xf32>
    tpu.vector_store %arg5[%c0_6, %c0_7, %c0_8], %9 {strides = array<i32>} : memref<1x8x64xf32, #tpu.memory_space<vmem>>, vector<1x8x64xf32>,
    return
  }
  func.func @transform_0(%arg0: i32, %arg1: i32) -> (i32, i32, i32) {
    %c0_i32 = arith.constant 0 : i32
    %c0_i32_0 = arith.constant 0 : i32
    return %arg0, %c0_i32, %arg1 : i32, i32, i32
  }
  func.func @transform_1(%arg0: i32, %arg1: i32) -> (i32, i32) {
    %c0_i32 = arith.constant 0 : i32
    %c0_i32_0 = arith.constant 0 : i32
    %c0_i32_1 = arith.constant 0 : i32
    return %c0_i32, %c0_i32_0 : i32, i32
  }
  func.func @transform_2(%arg0: i32, %arg1: i32) -> (i32, i32) {
    %c0_i32 = arith.constant 0 : i32
    %c0_i32_0 = arith.constant 0 : i32
    %c0_i32_1 = arith.constant 0 : i32
    return %c0_i32, %c0_i32_0 : i32, i32
  }
  func.func @transform_3(%arg0: i32, %arg1: i32) -> (i32, i32, i32) {
    %c0_i32 = arith.constant 0 : i32
    %c0_i32_0 = arith.constant 0 : i32
    return %arg0, %c0_i32, %arg1 : i32, i32, i32
  }
}

</mosaic_0001>

<bundles_post_ra>
// kernel: downsample.3
= control target key start
LH: loop header
LB: loop body
LE: loop exit
PB: predicated region body
PF: predicated region fallthrough
CT: control target
= control target key end

     0   :  { %s452_s12 = smov 0   ;;  %s454_s13 = smov 0   ;;  %s491_s0 = inlined_call_operand.vmem [shape: f32[2,4,64], index: 0, kind: input, shape index: {}]   ;;  %s492_s1 = inlined_call_operand.vmem [shape: f32[8,4], index: 1, kind: input, shape index: {}]   ;;  %s493_s2 = inlined_call_operand.vmem [shape: f32[8,1], index: 2, kind: input, shape index: {}]   ;;  %s494_s3 = inlined_call_operand.vmem [shape: f32[2,8,64], index: 3, kind: output, shape index: {}]  }
   0x1   :  { %s456_s14 = smov 0  }
   0x2 LB: > { %s25_s15 = sadd.s32 1, %s423_s13  ;;  %p363_p0 = scmp.ge.s32.totalorder %s427_s14, 1  ;;  %s427_s14 = sphi %s456_s14, %s13_s14   ;;  %s423_s13 = sphi %s454_s13, %s496_s13   ;;  %s419_s12 = sphi %s452_s12, %s495_s12  }
   0x3   : > { %p27_p1 = scmp.ge.s32.totalorder %s25_s15, 2  ;;  %p155_p2 = scmp.lt.s32.totalorder %s427_s14, 3 }
   0x5   : > { %s498_s15 = smov (%p27_p1, %s25_s15), 0  ;;  %p156_p3 = pnand %p363_p0, %p155_p2 }
   0x6   : > { %p183_p4 = scmp.lt.s32.totalorder (!%p156_p3), %s419_s12, 1  ;;  %v429_v0 = vmov (!%p156_p3), 0.0   ;;  %vm430_vm0 = vmmov (!%p156_p3), 0   ;;  %v199_v1 = vld [vmem:[%s493_s2] sm:$0xff] (!%p156_p3)  ;;  %v431_v2 = vmov (!%p156_p3), 0   ;;  %vm209_vm1 = vcmask (!%p156_p3), 1043456  }
   0x7   : > { %159 = sbr.rel (%p156_p3) target bundleno = 234 (0xea), region = 32  ;;  %372 = vmatprep.subr.mxu0 (!%p156_p3), %v429_v0  ;;  %374 = vmatprep.mubr.msk.f32.mxu0 (!%p156_p3), %vm430_vm0, %v429_v0  ;;  %v197_v3 = vld [vmem:[%s492_s1] sm:$0xff] (!%p156_p3)  ;;  %vm205_vm2 = vcmask (!%p156_p3), 31744   ;;  %vm283_vm3 = vcmask (!%p156_p3), 523264  }
   0x8   : > { %404 = vset.pattern.permute.xlu0 (!%p156_p3), %v431_v2 }
   0x9   : > { %202 = vperm.xlu0 (!%p156_p3), %404, %v199_v1  }
   0xe   : > { %s500_s12 = smov (!%p183_p4, %s419_s12), 1 }
   0xf   : > { %s364_s18 = sshll.u32 %s500_s12, 2  ;;  %s365_s24 = sshll.u32 %s500_s12, 3 }
  0x10   : > { %s189_s21 = scalar_lea.vmem %s491_s0, %s364_s18  ;;  %s196_s27 = scalar_lea.vmem %s494_s3, %s365_s24 }
  0x11   : > { %v198_v4 = vld [vmem:[%s189_s21] sm:$0xf] }
  0x12   : > { %373 = vmatpush3.msk.msra.mxu0 %vm209_vm1, %v198_v4 }
  0x13   : > { %375 = vmatmul.mubr.msk.f32.vlgmr.msra.gmra.mrb[0].mxu0 %vm205_vm2, %v197_v3 }
  0x88   : > { %v203_v5 = vpop.permute.xlu0 %202 }
  0xe6   : > { %v279_v6 = vpop.f32.mrb[0].mxu0 }
  0xe7   : > { %v280_v7 = vadd.f32 %v279_v6, %v203_v5  ;;  %v376_v8 = vpop.f32.mrb[1].mxu0 }
  0xe9   : > { %284 = vst.msk [vmem:[%s196_s27] sm:$0xff] %vm283_vm3, %v280_v7 }
  0xea PF: > { %s13_s14 = sadd.s32 1, %s427_s14   ;;  %s495_s12 = smov %s423_s13 }
  0xeb   : > { %p10_p5 = scmp.ge.s32.totalorder %s13_s14, 4   ;;  %s496_s13 = smov %s498_s15 }
  0xed   :  { %12 = sbr.rel (!%p10_p5) target bundleno = 2 (0x2), region = 62 }

// kernel: downsample.2
= control target key start
LH: loop header
LB: loop body
LE: loop exit
PB: predicated region body
PF: predicated region fallthrough
CT: control target
= control target key end

     0   :  { %s800_s18 = smov 0   ;;  %s802_s19 = smov 0   ;;  %s951_s0 = inlined_call_operand.vmem [shape: f32[2,4,256], index: 0, kind: input, shape index: {}]   ;;  %s952_s1 = inlined_call_operand.vmem [shape: f32[256,64], index: 1, kind: input, shape index: {}]   ;;  %s953_s2 = inlined_call_operand.vmem [shape: f32[8,4], index: 2, kind: input, shape index: {}]   ;;  %s954_s3 = inlined_call_operand.vmem [shape: f32[2,4,64], index: 3, kind: output, shape index: {0}]   ;;  %s955_s4 = inlined_call_operand.vmem [shape: f32[2,8,1], index: 4, kind: output, shape index: {1}]   ;;  %s956_s5 = inlined_call_operand.vmem [shape: f32[2,8,1], index: 5, kind: output, shape index: {2}]  }
   0x1   :  { %s804_s20 = smov 0  }
   0x2 LB: > { %s28_s21 = sadd.s32 1, %s762_s19  ;;  %p632_p0 = scmp.ge.s32.totalorder %s766_s20, 1  ;;  %s766_s20 = sphi %s804_s20, %s16_s20   ;;  %s762_s19 = sphi %s802_s19, %s958_s19   ;;  %s758_s18 = sphi %s800_s18, %s957_s18  }
   0x3   : > { %p30_p1 = scmp.ge.s32.totalorder %s28_s21, 2  ;;  %p213_p2 = scmp.lt.s32.totalorder %s766_s20, 3 }
   0x5   : > { %s960_s21 = smov (%p30_p1, %s28_s21), 0  ;;  %p214_p3 = pnand %p632_p0, %p213_p2 }
   0x6   : > { %v297_v0 = vld [vmem:[%s952_s1 + $0x80] sm:$0xff] (!%p214_p3)  ;;  %v298_v1 = vld [vmem:[%s952_s1 + $0x88] sm:$0xff] (!%p214_p3)  ;;  %p256_p4 = scmp.lt.s32.totalorder (!%p214_p3), %s758_s18, 1  ;;  %v299_v5 = vld [vmem:[%s952_s1 + $0x90] sm:$0xff] (!%p214_p3)  ;;  %v768_v50 = vmov (!%p214_p3), 0.0   ;;  %vm769_vm0 = vmmov (!%p214_p3), 0  }
   0x7   : > { %217 = sbr.rel (%p214_p3) target bundleno = 619 (0x26b), region = 32  ;;  %v281_v2 = vld [vmem:[%s952_s1] sm:$0xff] (!%p214_p3)  ;;  %v685_v3 = vpack.c.bf16 (!%p214_p3), %v298_v1, %v297_v0  ;;  %v282_v4 = vld [vmem:[%s952_s1 + $0x8] sm:$0xff] (!%p214_p3)  ;;  %v300_v6 = vld [vmem:[%s952_s1 + $0x98] sm:$0xff] (!%p214_p3)  ;;  %680 = vmatprep.subr.mxu1 (!%p214_p3), %v768_v50  ;;  %682 = vmatprep.mubr.msk.f32.mxu1 (!%p214_p3), %vm769_vm0, %v768_v50  ;;  %vm386_vm1 = vcmask (!%p214_p3), 519168   ;;  %vm393_vm2 = vcmask (!%p214_p3), 1043456  }
   0x8   : > { %v687_v7 = vpack.c.bf16 (!%p214_p3), %v282_v4, %v281_v2  ;;  %v689_v8 = vpack.c.bf16 (!%p214_p3), %v300_v6, %v299_v5  ;;  %v283_v9 = vld [vmem:[%s952_s1 + $0x10] sm:$0xff] (!%p214_p3)  ;;  %v284_v10 = vld [vmem:[%s952_s1 + $0x18] sm:$0xff] (!%p214_p3)  ;;  %v301_v11 = vld [vmem:[%s952_s1 + $0xa0] sm:$0xff] (!%p214_p3)  ;;  %vm389_vm3 = vcmask (!%p214_p3), 31744   ;;  %vm471_vm4 = vcmask (!%p214_p3), 7168  }
   0x9   : > { %686 = vmatprep.subr.bf16.mxu0 (!%p214_p3), %v685_v3  ;;  %v302_v12 = vld [vmem:[%s952_s1 + $0xa8] sm:$0xff] (!%p214_p3)  ;;  %v691_v13 = vpack.c.bf16 (!%p214_p3), %v284_v10, %v283_v9  ;;  %v285_v15 = vld [vmem:[%s952_s1 + $0x20] sm:$0xff] (!%p214_p3)  ;;  %v303_v17 = vld [vmem:[%s952_s1 + $0xb0] sm:$0xff] (!%p214_p3)  ;;  %vm475_vm5 = vcmask (!%p214_p3), 523264  }
   0xa   : > { %688 = vmatpush3.bf16.msra.mxu0 (!%p214_p3), %v687_v7  ;;  %v693_v14 = vpack.c.bf16 (!%p214_p3), %v302_v12, %v301_v11  ;;  %v286_v16 = vld [vmem:[%s952_s1 + $0x28] sm:$0xff] (!%p214_p3)  ;;  %v304_v18 = vld [vmem:[%s952_s1 + $0xb8] sm:$0xff] (!%p214_p3)  ;;  %v287_v21 = vld [vmem:[%s952_s1 + $0x30] sm:$0xff] (!%p214_p3) }
   0xb   : > { %690 = vmatprep.subr.bf16.mxu0 (!%p214_p3), %v689_v8  ;;  %v695_v19 = vpack.c.bf16 (!%p214_p3), %v286_v16, %v285_v15  ;;  %v697_v20 = vpack.c.bf16 (!%p214_p3), %v304_v18, %v303_v17  ;;  %v288_v22 = vld [vmem:[%s952_s1 + $0x38] sm:$0xff] (!%p214_p3)  ;;  %v305_v23 = vld [vmem:[%s952_s1 + $0xc0] sm:$0xff] (!%p214_p3)  ;;  %v306_v24 = vld [vmem:[%s952_s1 + $0xc8] sm:$0xff] (!%p214_p3) }
   0xc   : > { %v699_v27 = vpack.c.bf16 (!%p214_p3), %v288_v22, %v287_v21  ;;  %v701_v28 = vpack.c.bf16 (!%p214_p3), %v306_v24, %v305_v23  ;;  %v289_v29 = vld [vmem:[%s952_s1 + $0x40] sm:$0xff] (!%p214_p3)  ;;  %v290_v30 = vld [vmem:[%s952_s1 + $0x48] sm:$0xff] (!%p214_p3)  ;;  %v307_v31 = vld [vmem:[%s952_s1 + $0xd0] sm:$0xff] (!%p214_p3) }
   0xd   : > { %v308_v32 = vld [vmem:[%s952_s1 + $0xd8] sm:$0xff] (!%p214_p3)  ;;  %v703_v33 = vpack.c.bf16 (!%p214_p3), %v290_v30, %v289_v29  ;;  %v291_v35 = vld [vmem:[%s952_s1 + $0x50] sm:$0xff] (!%p214_p3)  ;;  %v309_v37 = vld [vmem:[%s952_s1 + $0xe0] sm:$0xff] (!%p214_p3) }
   0xe   : > { %s962_s18 = smov (!%p256_p4, %s758_s18), 1  ;;  %692 = vmatpush3.bf16.msra.mxu0 %v691_v13  ;;  %v705_v34 = vpack.c.bf16 %v308_v32, %v307_v31  ;;  %v292_v36 = vld [vmem:[%s952_s1 + $0x58] sm:$0xff]  ;;  %v310_v38 = vld [vmem:[%s952_s1 + $0xe8] sm:$0xff]  ;;  %v293_v41 = vld [vmem:[%s952_s1 + $0x60] sm:$0xff] }
   0xf   : > { %s851_s17 = sshll.u32 %s962_s18, 3  ;;  %694 = vmatprep.subr.bf16.mxu0 %v693_v14  ;;  %v707_v39 = vpack.c.bf16 %v292_v36, %v291_v35  ;;  %v709_v40 = vpack.c.bf16 %v310_v38, %v309_v37  ;;  %v294_v42 = vld [vmem:[%s952_s1 + $0x68] sm:$0xff]  ;;  %v311_v43 = vld [vmem:[%s952_s1 + $0xf0] sm:$0xff]  ;;  %v312_v44 = vld [vmem:[%s952_s1 + $0xf8] sm:$0xff]  ;;  %s635_s29 = sshll.u32 %s962_s18, 2 }
  0x10   : > { %s263_s7 = scalar_lea.vmem %s951_s0, %s851_s17  ;;  %v711_v45 = vpack.c.bf16 %v294_v42, %v293_v41  ;;  %v713_v46 = vpack.c.bf16 %v312_v44, %v311_v43  ;;  %v295_v47 = vld [vmem:[%s952_s1 + $0x70] sm:$0xff]  ;;  %v296_v48 = vld [vmem:[%s952_s1 + $0x78] sm:$0xff]  ;;  %v388_v54 = vld [vmem:[%s953_s2] sm:$0xff]  ;;  %s275_s11 = scalar_lea.vmem %s955_s4, %s851_s17 }
  0x11   : > { %v280_v25 = vld [vmem:[%s263_s7] sm:$0xff]  ;;  %v715_v49 = vpack.c.bf16 %v296_v48, %v295_v47  ;;  %s271_s7 = scalar_lea.vmem %s954_s3, %s635_s29  ;;  %472 = vst.msk [vmem:[%s275_s11] sm:$0xff] %vm471_vm4, %v768_v50  ;;  %s279_s14 = scalar_lea.vmem %s956_s5, %s851_s17 }
  0x12   : > { %v314_v26 = vcombine.high %v280_v25, %v280_v25  ;;  %696 = vmatpush3.bf16.msra.mxu0 %v695_v19  ;;  %473 = vst.msk [vmem:[%s279_s14] sm:$0xff] %vm471_vm4, %v768_v50 }
  0x13   : > { %698 = vmatprep.subr.bf16.mxu0 %v697_v20 }
  0x14   : > { %380 = vmatprep.mubr.f32.mxu0 %v314_v26 }
  0x16   : > { %700 = vmatpush3.bf16.msra.mxu0 %v699_v27 }
  0x17   : > { %702 = vmatprep.subr.bf16.mxu0 %v701_v28 }
  0x18   : > { %v474_v60 = vld [vmem:[%s275_s11] sm:$0xff] }
  0x19   : > { %v482_v63 = vld [vmem:[%s279_s14] sm:$0xff] }
  0x1a   : > { %704 = vmatpush3.bf16.msra.mxu0 %v703_v33 }
  0x1b   : > { %706 = vmatprep.subr.bf16.mxu0 %v705_v34 }
  0x1e   : > { %708 = vmatpush3.bf16.msra.mxu0 %v707_v39 }
  0x1f   : > { %710 = vmatprep.subr.bf16.mxu0 %v709_v40 }
  0x22   : > { %712 = vmatpush3.bf16.msra.mxu0 %v711_v45 }
  0x23   : > { %714 = vmatprep.subr.bf16.mxu0 %v713_v46 }
  0x26   : > { %716 = vmatpush3.bf16.msra.mxu0 %v715_v49 }
  0x29   : > { %381 = vmatmul.mubr.f32.vlgmr.msra.gmra.mrb[0].mxu0 %v280_v25 }
  0xfc   : > { %v675_v51 = vpop.f32.mrb[0].mxu0 }
  0xfd   : > { %v676_v52 = vpop.f32.mrb[1].mxu0 }
  0xfe   : > { %v677_v53 = vadd.f32 %v676_v52, %v675_v51 }
 0x100   : > { %387 = vst.msk [vmem:[%s271_s7] sm:$0xf] %vm386_vm1, %v677_v53  ;;  %681 = vmatpush3.msk.msra.mxu1 %vm393_vm2, %v677_v53 }
 0x101   : > { %683 = vmatmul.mubr.msk.f32.vlgmr.msra.gmra.mrb[0].mxu1 %vm389_vm3, %v388_v54 }
 0x1d4   : > { %v463_v55 = vpop.f32.mrb[0].mxu1 }
 0x1d5   : > { %v483_v56 = vmul.f32 %v463_v55, %v463_v55  ;;  %v684_v57 = vpop.f32.mrb[1].mxu1  ;;  %v476_v58 = vsel %vm475_vm5, %v463_v55, 0.0 }
 0x1d6   : > { %477 = vadd.xlane.f32.xlu0 %v476_v58 }
 0x1d7   : > { %v484_v59 = vsel %vm475_vm5, %v483_v56, 0.0 }
 0x1da   : > { %485 = vadd.xlane.f32.xlu0 %v484_v59 }
 0x263   : > { %v478_v61 = vpop.xlane.xlu0 %477 }
 0x264   : > { %v479_v62 = vadd.f32 %v478_v61, %v474_v60 }
 0x266   : > { %481 = vst.msk [vmem:[%s275_s11] sm:$0xff] %vm471_vm4, %v479_v62 }
 0x267   : > { %v486_v0 = vpop.xlane.xlu0 %485 }
 0x268   : > { %v487_v1 = vadd.f32 %v486_v0, %v482_v63 }
 0x26a   : > { %488 = vst.msk [vmem:[%s279_s14] sm:$0xff] %vm471_vm4, %v487_v1 }
 0x26b PF: > { %s16_s20 = sadd.s32 1, %s766_s20   ;;  %s957_s18 = smov %s762_s19 }
 0x26c   : > { %p13_p5 = scmp.ge.s32.totalorder %s16_s20, 4   ;;  %s958_s19 = smov %s960_s21 }
 0x26e   :  { %15 = sbr.rel (!%p13_p5) target bundleno = 2 (0x2), region = 90 }

</bundles_post_ra>
